<compile_context>
chip_gen: v7x
topology: tpu7x:2x2x1
jax: 0.10.0
libtpu: 0.0.40
codegen_flags: <defaults>
</compile_context>

<pallas_src>
import functools

import jax
import jax.numpy as jnp
from jax import lax
from jax.experimental import pallas as pl
from jax.experimental.pallas import tpu as pltpu

NUM_CLASSES = 1000   # module hardcodes self.C = 1000
SMOOTHING = 0.1      # module default


def _round_up(a, b):
    return ((a + b - 1) // b) * b


def _ls_ce_kernel(x_ref, tgt_ref, out_ref, *, n_rows):
    # x_ref: (TM, C) logits block (native dtype), tgt_ref: (TM, 1) int32,
    # out_ref: (1, 1) f32 per-tile partial sum.
    x_raw = x_ref[...]                                        # (TM, C), f32 or bf16
    t = tgt_ref[...]                                          # (TM, 1) int32
    tm, c = x_raw.shape

    # (1, C) iota broadcast against (TM, 1) targets; no (TM, C) int32 temp.
    iota = lax.broadcasted_iota(jnp.int32, (1, c), 1)
    sel = iota == t                                           # (TM, C) bool

    # Target-select (row-sum with exactly one nonzero -> exact) and row-max on the
    # native-dtype tile; up-cast only the (TM, 1) results.
    x_t = jnp.sum(jnp.where(sel, x_raw, jnp.zeros_like(x_raw)),
                  axis=-1, keepdims=True).astype(jnp.float32)           # (TM, 1)
    m = jnp.max(x_raw, axis=-1, keepdims=True).astype(jnp.float32)      # (TM, 1)

    # exp / sum-exp and the class-sum in f32; (x_f32 - m) is transient exp input only.
    x_f32 = x_raw.astype(jnp.float32)
    sum_x = jnp.sum(x_f32, axis=-1, keepdims=True)                      # (TM, 1)
    lse = m + jnp.log(jnp.sum(jnp.exp(x_f32 - m), axis=-1, keepdims=True))

    one_minus_d = jnp.float32(1.0 - SMOOTHING)
    d_over_c = jnp.float32(SMOOTHING / NUM_CLASSES)
    # loss_i = LSE(x_i) - (1-d) * x[i, t_i] - (d/C) * sum_j x[i, j]
    loss = lse - one_minus_d * x_t - d_over_c * sum_x                   # (TM, 1)

    # Mask rows past the true batch size (ragged last tile).  Must stay a true select
    # (not multiplicative masking) so garbage/NaN in padded rows cannot propagate.
    row = pl.program_id(0) * tm + lax.broadcasted_iota(jnp.int32, (tm, 1), 0)
    loss = jnp.where(row < n_rows, loss, 0.0)

    out_ref[...] = jnp.sum(loss, axis=0, keepdims=True)                 # (1, 1)


def label_smoothing_cross_entropy(x, target, *, block_rows=256):
    """x: (N, C) float logits (f32 or bf16), target: (N,) int class ids -> scalar f32."""
    n, c = x.shape
    assert c == NUM_CLASSES
    # Row tile: <= block_rows (256 keeps double-buffered inputs + in-kernel temps well
    # inside v5e's 16 MiB / v7x's 32 MiB default scoped VMEM), multiple of 8, and capped
    # near n/2 so the parallel grid axis has >= 2 steps (dual-TC sharding on v7x).
    tm = max(8, min(block_rows, _round_up(pl.cdiv(n, 2), 8)))
    num_tiles = pl.cdiv(n, tm)
    tgt = target.astype(jnp.int32).reshape(n, 1)

    partials = pl.pallas_call(
        functools.partial(_ls_ce_kernel, n_rows=n),
        out_shape=jax.ShapeDtypeStruct((num_tiles, 1), jnp.float32),
        grid=(num_tiles,),
        in_specs=[
            pl.BlockSpec((tm, c), lambda i: (i, 0)),
            pl.BlockSpec((tm, 1), lambda i: (i, 0)),
        ],
        out_specs=pl.BlockSpec((1, 1), lambda i: (i, 0)),
        compiler_params=pltpu.CompilerParams(
            dimension_semantics=("parallel",),
        ),
    )(x, tgt)
    # Final mean over the true batch size, applied exactly once outside the kernel.
    return jnp.sum(partials) / jnp.float32(n)


def _reference(x, target):
    logp = jax.nn.log_softmax(x.astype(jnp.float32), axis=-1)
    q = jax.nn.one_hot(target, NUM_CLASSES, dtype=jnp.float32)
    d = jnp.float32(SMOOTHING)
    q_new = (1.0 - d) * q + d / NUM_CLASSES
    return jnp.mean(jnp.sum(-q_new * logp, axis=-1))


if __name__ == "__main__":
    key = jax.random.PRNGKey(0)
    kx, kt, kx2, kt2 = jax.random.split(key, 4)

    # Case 1: small f32 batch (multiple of 8).
    batch = 8
    x = jax.random.normal(kx, (batch, NUM_CLASSES), dtype=jnp.float32)
    target = jax.random.randint(kt, (batch,), 0, NUM_CLASSES, dtype=jnp.int32)
    loss = label_smoothing_cross_entropy(x, target)
    jax.block_until_ready(loss)
    ref = _reference(x, target)
    assert jnp.allclose(loss, ref, rtol=1e-5, atol=1e-5), (loss, ref)

    # Case 2: ragged batch (exercises padded-row masking in the last tile).
    batch2 = 12
    x2 = jax.random.normal(kx2, (batch2, NUM_CLASSES), dtype=jnp.float32)
    target2 = jax.random.randint(kt2, (batch2,), 0, NUM_CLASSES, dtype=jnp.int32)
    loss2 = label_smoothing_cross_entropy(x2, target2)
    jax.block_until_ready(loss2)
    ref2 = _reference(x2, target2)
    assert jnp.allclose(loss2, ref2, rtol=1e-5, atol=1e-5), (loss2, ref2)

    # Case 3: bf16 logits on the wire (kernel does f32 math on the exact bf16 values).
    x_bf16 = x.astype(jnp.bfloat16)
    loss3 = label_smoothing_cross_entropy(x_bf16, target)
    jax.block_until_ready(loss3)
    ref3 = _reference(x_bf16, target)
    assert jnp.allclose(loss3, ref3, rtol=1e-4, atol=1e-4), (loss3, ref3)

    print("KERNEL_OK")
</pallas_src>

<mosaic_0001>
module attributes {stable_mosaic.version = 11 : i64} {
  func.func @_ls_ce_kernel(%arg0: i32, %arg1: memref<8x1000xf32, #tpu.memory_space<vmem>>, %arg2: memref<8x1xi32, #tpu.memory_space<vmem>>, %arg3: memref<1x1xf32, #tpu.memory_space<vmem>>) attributes {dimension_semantics = [#tpu.dimension_semantics<parallel>], iteration_bounds = array<i64: 1>, scalar_prefetch = 0 : i64, scratch_operands = 0 : i64, tpu.core_type = #tpu.core_type<tc>, window_params = [{transform_indices = @transform_0, window_bounds = array<i64: 8, 1000>}, {transform_indices = @transform_1, window_bounds = array<i64: 8, 1>}, {transform_indices = @transform_2, window_bounds = array<i64: 1, 1>}]} {
    %c0 = arith.constant 0 : index
    %c0_0 = arith.constant 0 : index
    %0 = vector.load %arg1[%c0, %c0_0] : memref<8x1000xf32, #tpu.memory_space<vmem>>, vector<8x1000xf32>
    %c0_1 = arith.constant 0 : index
    %c0_2 = arith.constant 0 : index
    %1 = vector.load %arg2[%c0_1, %c0_2] : memref<8x1xi32, #tpu.memory_space<vmem>>, vector<8x1xi32>
    %2 = tpu.iota {dimensions = array<i32: 1>} : vector<1x1000xi32>
    %3 = vector.broadcast %2 : vector<1x1000xi32> to vector<8x1000xi32>
    %4 = vector.broadcast %1 : vector<8x1xi32> to vector<8x1000xi32>
    %5 = arith.cmpi eq, %3, %4 : vector<8x1000xi32>
    %cst = arith.constant 0.000000e+00 : f32
    %6 = vector.broadcast %cst : f32 to vector<8x1000xf32>
    %7 = arith.select %5, %0, %6 : vector<8x1000xi1>, vector<8x1000xf32>
    %cst_3 = arith.constant dense<0.000000e+00> : vector<8xf32>
    %8 = vector.multi_reduction <add>, %7, %cst_3 [1] : vector<8x1000xf32> to vector<8xf32>
    %9 = vector.shape_cast %8 : vector<8xf32> to vector<8x1xf32>
    %cst_4 = arith.constant dense<0xFF800000> : vector<8xf32>
    %10 = vector.multi_reduction <maximumf>, %0, %cst_4 [1] : vector<8x1000xf32> to vector<8xf32>
    %11 = vector.shape_cast %10 : vector<8xf32> to vector<8x1xf32>
    %cst_5 = arith.constant dense<0.000000e+00> : vector<8xf32>
    %12 = vector.multi_reduction <add>, %0, %cst_5 [1] : vector<8x1000xf32> to vector<8xf32>
    %13 = vector.shape_cast %12 : vector<8xf32> to vector<8x1xf32>
    %14 = vector.broadcast %11 : vector<8x1xf32> to vector<8x1000xf32>
    %15 = arith.subf %0, %14 : vector<8x1000xf32>
    %16 = math.exp %15 : vector<8x1000xf32>
    %cst_6 = arith.constant dense<0.000000e+00> : vector<8xf32>
    %17 = vector.multi_reduction <add>, %16, %cst_6 [1] : vector<8x1000xf32> to vector<8xf32>
    %18 = vector.shape_cast %17 : vector<8xf32> to vector<8x1xf32>
    %19 = math.log %18 : vector<8x1xf32>
    %20 = arith.addf %11, %19 : vector<8x1xf32>
    %cst_7 = arith.constant 0.899999976 : f32
    %21 = vector.broadcast %cst_7 : f32 to vector<8x1xf32>
    %22 = arith.mulf %21, %9 : vector<8x1xf32>
    %23 = arith.subf %20, %22 : vector<8x1xf32>
    %cst_8 = arith.constant 9.99999974E-5 : f32
    %24 = vector.broadcast %cst_8 : f32 to vector<8x1xf32>
    %25 = arith.mulf %24, %13 : vector<8x1xf32>
    %26 = arith.subf %23, %25 : vector<8x1xf32>
    %c8_i32 = arith.constant 8 : i32
    %27 = arith.muli %arg0, %c8_i32 : i32
    %28 = tpu.iota {dimensions = array<i32: 0>} : vector<8x1xi32>
    %29 = vector.broadcast %27 : i32 to vector<8x1xi32>
    %30 = arith.addi %29, %28 : vector<8x1xi32>
    %c8_i32_9 = arith.constant 8 : i32
    %31 = vector.broadcast %c8_i32_9 : i32 to vector<8x1xi32>
    %32 = arith.cmpi slt, %30, %31 : vector<8x1xi32>
    %cst_10 = arith.constant 0.000000e+00 : f32
    %33 = vector.broadcast %cst_10 : f32 to vector<8x1xf32>
    %34 = arith.select %32, %26, %33 : vector<8x1xi1>, vector<8x1xf32>
    %cst_11 = arith.constant dense<0.000000e+00> : vector<1xf32>
    %35 = vector.multi_reduction <add>, %34, %cst_11 [0] : vector<8x1xf32> to vector<1xf32>
    %36 = vector.shape_cast %35 : vector<1xf32> to vector<1x1xf32>
    %c0_12 = arith.constant 0 : index
    %c0_13 = arith.constant 0 : index
    %37 = vector.load %arg3[%c0_12, %c0_13] : memref<1x1xf32, #tpu.memory_space<vmem>>, vector<1x1xf32>
    tpu.vector_store %arg3[%c0_12, %c0_13], %36 {strides = array<i32>} : memref<1x1xf32, #tpu.memory_space<vmem>>, vector<1x1xf32>,
    return
  }
  func.func @transform_0(%arg0: i32) -> (i32, i32) {
    %c0_i32 = arith.constant 0 : i32
    %c0_i32_0 = arith.constant 0 : i32
    return %arg0, %c0_i32 : i32, i32
  }
  func.func @transform_1(%arg0: i32) -> (i32, i32) {
    %c0_i32 = arith.constant 0 : i32
    %c0_i32_0 = arith.constant 0 : i32
    return %arg0, %c0_i32 : i32, i32
  }
  func.func @transform_2(%arg0: i32) -> (i32, i32) {
    %c0_i32 = arith.constant 0 : i32
    %c0_i32_0 = arith.constant 0 : i32
    return %arg0, %c0_i32 : i32, i32
  }
}

</mosaic_0001>

<bundles_post_ra>
// kernel: tpu_custom_call.1
= control target key start
LH: loop header
LB: loop body
LE: loop exit
PB: predicated region body
PF: predicated region fallthrough
CT: control target
= control target key end

     0   :  { %7 = vsyncpa [#allocation3], 0  ;;  %s323_s0 = inlined_call_operand.hbm [shape: f32[8,1000], index: 0, kind: input, shape index: {}]   ;;  %s324_s1 = inlined_call_operand.vmem [shape: s32[8,1], index: 1, kind: input, shape index: {}]   ;;  %s325_s2 = inlined_call_operand.hbm [shape: f32[1,1], index: 2, kind: output, shape index: {}]  }
   0x1   :  { %8 = vsyncpa [#allocation4], 0  ;;  %s233_s9 = smov [#allocation2]   ;;  %s185_s13 = scalar_lea.hbm %s323_s0, 1024 }
   0x2   :  { %s15_s10 = sshll.u32 %s233_s9, 4  ;;  %p186_p0 = scmp.ne.s32.totalorder %s323_s0, %s185_s13  ;;  %s16_s10 = int_to_ptr.vmem [resolvable:$true] %s15_s10 }
   0x3   :  { %p189_p1 = scmp.lt.u32.totalorder %s185_s13, %s323_s0 }
   0x5   :  { %p191_p2 = pnand %p189_p1, %p186_p0 }
   0x7   :  { %194 = shalt.err (!%p191_p2)
}
   0x8   :  { %s195_s18 = scalar_lea.vmem %s16_s10, 1024  ;;  %p200_p4 = scmp.lt.s32.totalorder %s16_s10, %s16_s10 }
   0x9   :  { %p196_p3 = scmp.ne.s32.totalorder %s16_s10, %s195_s18  ;;  %p201_p5 = scmp.lt.s32.totalorder %s195_s18, %s195_s18 }
   0xb   :  { %p202_p6 = por %p201_p5, %p200_p4 }
   0xd   :  { %p203_p7 = pnand %p202_p6, %p196_p3 }
   0xf   :  { %206 = shalt.err (!%p203_p7)
}
  0x10   :  { %18 = dma.hbm_to_vmem [thread:$0]  %s323_s0, 1024, %s16_s10, [#allocation3]  }
  0x11   :  { %229 = dma.done.wait [#allocation3], 1024  }
  0x12   :  { %230 = vsyncadd [#allocation3], 4294966272  ;;  %v234_v0 = vmov 0   ;;  %v24_v1 = vld [vmem:[#allocation2] sm:$0xff]  ;;  %v25_v2 = vld [vmem:[#allocation2 + $0x8] sm:$0xff]  ;;  %vm67_vm0 = vcmask 850944   ;;  %v33_v18 = vlaneseq }
  0x13   :  { %166 = vset.pattern.permute.xlu0 %v234_v0  ;;  %v26_v3 = vld [vmem:[#allocation2 + $0x10] sm:$0xff]  ;;  %v263_v4 = vld [vmem:[#allocation2 + $0x18] sm:$0xff]  ;;  %v265_v5 = vld [vmem:[#allocation2 + $0x20] sm:$0xff]  ;;  %v82_v39 = vadd.f32 %v25_v2, %v24_v1  ;;  %vm146_vm9 = vcmask 0  }
  0x14   :  { %v267_v6 = vld [vmem:[#allocation2 + $0x28] sm:$0xff]  ;;  %v269_v7 = vld [vmem:[#allocation2 + $0x30] sm:$0xff]  ;;  %v271_v8 = vld [vmem:[#allocation2 + $0x38] sm:$0xff]  ;;  %v72_v9 = vmax.f32 %v24_v1, %v265_v5  ;;  %v34_v23 = vand.u32 127, %v33_v18 }
  0x15   :  { %v73_v10 = vmax.f32 %v25_v2, %v267_v6  ;;  %v74_v11 = vmax.f32 %v26_v3, %v269_v7  ;;  %v75_v12 = vsel %vm67_vm0, %v271_v8, -inf  ;;  %v32_v17 = vld [vmem:[%s324_s1] sm:$0xff]  ;;  %v83_v50 = vadd.f32 %v82_v39, %v26_v3  ;;  %s235_s1 = smov [#allocation5]  }
  0x16   :  { %v76_v13 = vmax.f32 %v263_v4, %v75_v12  ;;  %v35_v29 = vadd.s32 128, %v34_v23  ;;  %v36_v32 = vadd.s32 256, %v34_v23  ;;  %v37_v37 = vadd.s32 384, %v34_v23  ;;  %s154_s22 = sshll.u32 %s235_s1, 4  ;;  %s155_s22 = int_to_ptr.vmem [resolvable:$true] %s154_s22 }
  0x17   :  { %v77_v14 = vmax.f32 %v72_v9, %v73_v10  ;;  %v38_v41 = vadd.s32 512, %v34_v23  ;;  %v39_v46 = vadd.s32 640, %v34_v23  ;;  %v40_v58 = vadd.s32 768, %v34_v23  ;;  %s207_s23 = scalar_lea.vmem %s155_s22, 16  ;;  %s211_s24 = scalar_lea.vmem %s155_s22, 32 }
  0x18   :  { %v78_v15 = vmax.f32 %v74_v11, %v76_v13  ;;  %v84_v59 = vadd.f32 %v83_v50, %v263_v4  ;;  %v41_v61 = vadd.s32 896, %v34_v23  ;;  %p208_p8 = scmp.ne.s32.totalorder %s155_s22, %s207_s23  ;;  %p212_p9 = scmp.lt.s32.totalorder %s155_s22, %s155_s22 }
  0x19   :  { %p213_p10 = scmp.lt.s32.totalorder %s211_s24, %s207_s23 }
  0x1a   :  { %v79_v16 = vmax.f32 %v77_v14, %v78_v15 }
  0x1b   :  { %p214_p11 = por %p213_p10, %p212_p9 }
  0x1c   :  { %80 = vmax.xlane.f32.xlu0 %v79_v16 }
  0x1d   :  { %p215_p12 = pnand %p214_p11, %p208_p8 }
  0x32   :  { %43 = vperm.xlu0 %166, %v32_v17  }
  0xa9   :  { %v282_v19 = vpop.xlane.xlu0 %80 }
  0xaa   :  { %v92_v20 = vsub.f32 %v24_v1, %v282_v19  ;;  %v93_v21 = vsub.f32 %v25_v2, %v282_v19  ;;  %v94_v22 = vsub.f32 %v26_v3, %v282_v19  ;;  %v95_v24 = vsub.f32 %v263_v4, %v282_v19 }
  0xab   :  { %v96_v27 = vsub.f32 %v265_v5, %v282_v19  ;;  %v97_v30 = vsub.f32 %v267_v6, %v282_v19  ;;  %v99_v33 = vsub.f32 %v271_v8, %v282_v19  ;;  %v98_v35 = vsub.f32 %v269_v7, %v282_v19 }
  0xac   :  { %v100_v25 = vmul.f32 1.442695, %v92_v20  ;;  %v102_v26 = vmul.f32 1.442695, %v93_v21  ;;  %v104_v28 = vmul.f32 1.442695, %v94_v22 }
  0xad   :  { %v106_v31 = vmul.f32 1.442695, %v95_v24  ;;  %v108_v36 = vmul.f32 1.442695, %v96_v27  ;;  %v110_v38 = vmul.f32 1.442695, %v97_v30 }
  0xae   :  { %167 = vpow2.f32 %v100_v25  ;;  %v114_v40 = vmul.f32 1.442695, %v99_v33  ;;  %v112_v43 = vmul.f32 1.442695, %v98_v35  ;;  %v88_v22 = vsel %vm67_vm0, %v271_v8, 0.0 }
  0xaf   :  { %169 = vpow2.f32 %v102_v26 }
  0xb0   :  { %171 = vpow2.f32 %v104_v28 }
  0xb1   :  { %v44_v34 = vpop.permute.xlu0 %43  ;;  %173 = vpow2.f32 %v106_v31 }
  0xb2   :  { %vm45_vm1 = vcmp.eq.s32.totalorder %v34_v23, %v44_v34  ;;  %vm46_vm2 = vcmp.eq.s32.totalorder %v35_v29, %v44_v34  ;;  %vm47_vm3 = vcmp.eq.s32.totalorder %v36_v32, %v44_v34  ;;  %175 = vpow2.f32 %v108_v36 }
  0xb3   :  { %v53_v42 = vsel %vm45_vm1, %v24_v1, 0.0  ;;  %vm48_vm4 = vcmp.eq.s32.totalorder %v37_v37, %v44_v34  ;;  %v54_v44 = vsel %vm46_vm2, %v25_v2, 0.0  ;;  %v55_v45 = vsel %vm47_vm3, %v26_v3, 0.0 }
  0xb4   :  { %177 = vpow2.f32 %v110_v38  ;;  %v61_v47 = vadd.f32 %v54_v44, %v53_v42  ;;  %vm49_vm5 = vcmp.eq.s32.totalorder %v38_v41, %v44_v34  ;;  %v56_v49 = vsel %vm48_vm4, %v263_v4, 0.0 }
  0xb5   :  { %179 = vpow2.f32 %v114_v40  ;;  %v57_v55 = vsel %vm49_vm5, %v265_v5, 0.0  ;;  %vm50_vm6 = vcmp.eq.s32.totalorder %v39_v46, %v44_v34  ;;  %vm51_vm7 = vcmp.eq.s32.totalorder %v40_v58, %v44_v34 }
  0xb6   :  { %181 = vpow2.f32 %v112_v43  ;;  %v62_v52 = vadd.f32 %v61_v47, %v55_v45  ;;  %v58_v1 = vsel %vm50_vm6, %v267_v6, 0.0  ;;  %v85_v3 = vadd.f32 %v84_v59, %v265_v5 }
  0xb7   :  { %vm52_vm8 = vcmp.eq.s32.totalorder %v41_v61, %v44_v34  ;;  %v59_v14 = vsel %vm51_vm7, %v269_v7, 0.0 }
  0xb8   :  { %v168_v48 = vpop.eup %167  ;;  %v63_v56 = vadd.f32 %v62_v52, %v56_v49  ;;  %v60_v15 = vsel %vm52_vm8, %v271_v8, 0.0  ;;  %v86_v16 = vadd.f32 %v85_v3, %v267_v6 }
  0xb9   :  { %v170_v51 = vpop.eup %169  ;;  %v68_v21 = vsel %vm67_vm0, %v60_v15, 0.0 }
  0xba   :  { %v116_v53 = vadd.f32 %v170_v51, %v168_v48  ;;  %v172_v54 = vpop.eup %171  ;;  %v64_v63 = vadd.f32 %v63_v56, %v57_v55  ;;  %v87_v5 = vadd.f32 %v86_v16, %v269_v7 }
  0xbb   :  { %v174_v60 = vpop.eup %173 }
  0xbc   :  { %v117_v57 = vadd.f32 %v172_v54, %v116_v53  ;;  %v176_v0 = vpop.eup %175  ;;  %v65_v12 = vadd.f32 %v64_v63, %v58_v1  ;;  %v89_v24 = vadd.f32 %v88_v22, %v87_v5 }
  0xbe   :  { %v118_v62 = vadd.f32 %v174_v60, %v117_v57  ;;  %v178_v9 = vpop.eup %177  ;;  %v66_v20 = vadd.f32 %v65_v12, %v59_v14 }
  0xbf   :  { %v180_v10 = vpop.eup %179 }
  0xc0   :  { %v119_v2 = vadd.f32 %v176_v0, %v118_v62  ;;  %v182_v13 = vpop.eup %181  ;;  %v122_v17 = vsel %vm67_vm0, %v180_v10, 0.0  ;;  %v69_v23 = vadd.f32 %v68_v21, %v66_v20 }
  0xc2   :  { %v120_v11 = vadd.f32 %v178_v9, %v119_v2 }
  0xc4   :  { %v121_v4 = vadd.f32 %v182_v13, %v120_v11 }
  0xc6   :  { %v123_v18 = vadd.f32 %v122_v17, %v121_v4 }
  0xc8   :  { %124 = vadd.xlane.f32.xlu1 %v123_v18 }
  0xcc   :  { %70 = vadd.xlane.f32.xlu1 %v69_v23 }
  0xd0   :  { %90 = vadd.xlane.f32.xlu1 %v89_v24 }
 0x155   :  { %v125_v25 = vpop.xlane.xlu1 %124 }
 0x156   :  { %183 = vlog2.f32 %v125_v25 }
 0x159   :  { %v71_v26 = vpop.xlane.xlu1 %70 }
 0x15a   :  { %v129_v30 = vmul.f32 0.9, %v71_v26 }
 0x15d   :  { %v91_v27 = vpop.xlane.xlu1 %90 }
 0x15e   :  { %v131_v31 = vmul.f32 0.0001, %v91_v27 }
 0x160   :  { %v184_v6 = vpop.eup %183 }
 0x161   :  { %v127_v28 = vmul.f32 0.6931472, %v184_v6 }
 0x163   :  { %v128_v29 = vadd.f32 %v127_v28, %v282_v19 }
 0x165   :  { %v130_v32 = vsub.f32 %v128_v29, %v129_v30 }
 0x167   :  { %v132_v33 = vsub.f32 %v130_v32, %v131_v31 }
 0x169   :  { %v140_v7 = vrot.slane %v132_v33, 4 }
 0x16b   :  { %v141_v34 = vadd.f32 %v140_v7, %v132_v33 }
 0x16d   :  { %v142_v35 = vrot.slane %v141_v34, 2 }
 0x16f   :  { %v143_v8 = vadd.f32 %v142_v35, %v141_v34 }
 0x171   :  { %v144_v36 = vrot.slane %v143_v8, 1 }
 0x173   :  { %v145_v37 = vadd.f32 %v144_v36, %v143_v8 }
 0x175   :  { %147 = vst.msk [vmem:[#allocation5] sm:$0x1] %vm146_vm9, %v145_v37 }
 0x176   :  { %218 = shalt.err (!%p215_p12)
}
 0x177   :  { %s219_s27 = scalar_lea.hbm %s325_s2, 16 }
 0x178   :  { %p220_p13 = scmp.ne.s32.totalorder %s325_s2, %s219_s27  ;;  %p223_p0 = scmp.lt.u32.totalorder %s219_s27, %s325_s2 }
 0x17a   :  { %p225_p1 = pnand %p223_p0, %p220_p13 }
 0x17c   :  { %228 = shalt.err (!%p225_p1)
}
 0x17d   :  { %157 = dma.vmem_to_hbm [thread:$0]  %s155_s22, 16, %s325_s2, [#allocation4]  }
 0x17e   :  { %231 = dma.done.wait [#allocation4], 16  }
 0x17f   :  { %232 = vsyncadd [#allocation4], 4294967280 }
 0x180   :  { %161 = vsyncpa [#allocation3], 1 }
 0x181   :  { %162 = vsyncpa [#allocation4], 1 }

</bundles_post_ra>
